<compile_context>
chip_gen: v7x
topology: tpu7x:2x2x1
jax: 0.10.0
libtpu: 0.0.40
codegen_flags: <defaults>
</compile_context>

<pallas_src>
import math

import jax
import jax.numpy as jnp
from jax.experimental import pallas as pl
from jax.experimental.pallas import tpu as pltpu


def _copy_kernel(x_ref, o_ref):
    # Pure pass-through: one lane-dense block per grid step.
    o_ref[...] = x_ref[...]


# ~2 MiB per block: with default 2-deep double buffering on both input and
# output this is ~8 MiB of VMEM, comfortably under v7x's 64 MiB (and trivially
# under v5e/v6e's 128 MiB).
_TARGET_BLOCK_BYTES = 2 * 1024 * 1024
_VMEM_LIMIT_BYTES = 32 * 1024 * 1024


def _pallas_identity_copy(x: jax.Array) -> jax.Array:
    """Materialize `x` via a lane-dense Pallas identity-copy kernel."""
    total = math.prod(x.shape) if x.shape else 1
    if total == 0:
        return x

    itemsize = jnp.dtype(x.dtype).itemsize

    # Pick the widest lane-dense last dim (multiple of 128) that divides the
    # flattened size.  Wider lanes -> fewer, larger, unmasked stores.
    lane = 0
    for cand in (1024, 512, 256, 128):
        if total % cand == 0:
            lane = cand
            break

    if lane == 0:
        # Size not a multiple of 128: fall back to a single full-array block
        # (full-extent blocks are always legal regardless of (8,128) tiling).
        # TODO(synk): a huge tensor whose element count is not a multiple of
        # 128 would not fit in VMEM as a single block; pad-and-slice instead.
        x2 = x.reshape(1, total)
        out = pl.pallas_call(
            _copy_kernel,
            out_shape=jax.ShapeDtypeStruct(x2.shape, x.dtype),
        )(x2)
        return out.reshape(x.shape)

    rows = total // lane
    x2 = x.reshape(rows, lane)

    # Sublane granularity: 8 for 32-bit, 16 for bf16, 32 for int8/fp8 so the
    # packed-sublane layout stays unmasked for narrow dtypes.
    sub_mult = max(8, 32 // itemsize)

    rows_per_block = max(1, _TARGET_BLOCK_BYTES // (lane * itemsize))
    if rows_per_block >= rows:
        # Whole tensor in one block (full-extent sublane dim is always legal).
        tb = rows
    else:
        tb = max(sub_mult, (rows_per_block // sub_mult) * sub_mult)

    grid = (pl.cdiv(rows, tb),)

    out = pl.pallas_call(
        _copy_kernel,
        out_shape=jax.ShapeDtypeStruct((rows, lane), x.dtype),
        grid=grid,
        in_specs=[pl.BlockSpec((tb, lane), lambda i: (i, 0))],
        out_specs=pl.BlockSpec((tb, lane), lambda i: (i, 0)),
        compiler_params=pltpu.CompilerParams(
            # "parallel" lets the grid shard across v7x's 2 TensorCores.
            dimension_semantics=("parallel",),
            vmem_limit_bytes=_VMEM_LIMIT_BYTES,
        ),
    )(x2)
    return out.reshape(x.shape)


def select_tensor(tensors, ref_tensor, materialize: bool = True):
    """JAX/Pallas equivalent of SelectTensor.forward.

    Shape matching (last two dims) is static metadata resolved in Python at
    trace time, exactly mirroring the PyTorch loop (first match wins, None if
    nothing matches).  With materialize=False the selected tensor is returned
    directly (zero HBM traffic — the fastest option).  With materialize=True
    the selected tensor is streamed through the Pallas identity-copy kernel.
    """
    out_tensor = None
    for ten in tensors:
        if tuple(ten.shape[-2:]) == tuple(ref_tensor.shape[-2:]):
            out_tensor = ten
            break
    if out_tensor is None:
        return None
    if not materialize:
        return out_tensor
    return _pallas_identity_copy(out_tensor)


if __name__ == "__main__":
    key = jax.random.PRNGKey(0)
    k1, k2, k3, k4 = jax.random.split(key, 4)

    # Candidate tensors with different spatial sizes (NCHW).
    t_a = jax.random.normal(k1, (2, 4, 8, 8), dtype=jnp.float32)
    t_b = jax.random.normal(k2, (2, 4, 16, 16), dtype=jnp.float32)
    t_c = jax.random.normal(k3, (2, 4, 32, 32), dtype=jnp.float32)
    tensors = [t_a, t_b, t_c]

    # Reference tensor: its last two dims (16, 16) select t_b.
    ref = jax.random.normal(k4, (1, 1, 16, 16), dtype=jnp.float32)

    # Pallas copy path (single lane-dense block for this small tensor).
    out = select_tensor(tensors, ref)
    out = jax.block_until_ready(out)
    assert out.shape == t_b.shape and out.dtype == t_b.dtype
    assert bool(jnp.all(out == t_b))

    # Zero-copy path: selection is static, no kernel, no HBM traffic.
    out_nocopy = select_tensor(tensors, ref, materialize=False)
    assert out_nocopy is t_b

    # No-match case returns None, matching the PyTorch module.
    ref_nomatch = jnp.zeros((1, 1, 7, 7), dtype=jnp.float32)
    assert select_tensor(tensors, ref_nomatch) is None

    # Exercise the tiled multi-block path (4 MiB tensor -> 2 x ~2 MiB blocks).
    big = jax.random.normal(k1, (4, 8, 128, 256), dtype=jnp.float32)
    big_out = jax.block_until_ready(_pallas_identity_copy(big))
    assert bool(jnp.all(big_out == big))

    # Exercise the non-128-divisible fallback (single full-array block).
    odd = jax.random.normal(k2, (3, 5, 7), dtype=jnp.float32)
    odd_out = jax.block_until_ready(_pallas_identity_copy(odd))
    assert bool(jnp.all(odd_out == odd))

    print("KERNEL_OK")
</pallas_src>

<mosaic_0001>
module attributes {stable_mosaic.version = 11 : i64} {
  func.func @_copy_kernel(%arg0: i32, %arg1: memref<2x1024xf32, #tpu.memory_space<vmem>>, %arg2: memref<2x1024xf32, #tpu.memory_space<vmem>>) attributes {dimension_semantics = [#tpu.dimension_semantics<parallel>], iteration_bounds = array<i64: 1>, scalar_prefetch = 0 : i64, scratch_operands = 0 : i64, tpu.core_type = #tpu.core_type<tc>, window_params = [{transform_indices = @transform_0, window_bounds = array<i64: 2, 1024>}, {transform_indices = @transform_1, window_bounds = array<i64: 2, 1024>}]} {
    %c0 = arith.constant 0 : index
    %c0_0 = arith.constant 0 : index
    %0 = vector.load %arg1[%c0, %c0_0] : memref<2x1024xf32, #tpu.memory_space<vmem>>, vector<2x1024xf32>
    %c0_1 = arith.constant 0 : index
    %c0_2 = arith.constant 0 : index
    %1 = vector.load %arg2[%c0_1, %c0_2] : memref<2x1024xf32, #tpu.memory_space<vmem>>, vector<2x1024xf32>
    tpu.vector_store %arg2[%c0_1, %c0_2], %0 {strides = array<i32>} : memref<2x1024xf32, #tpu.memory_space<vmem>>, vector<2x1024xf32>,
    return
  }
  func.func @transform_0(%arg0: i32) -> (i32, i32) {
    %c0_i32 = arith.constant 0 : i32
    %c0_i32_0 = arith.constant 0 : i32
    return %arg0, %c0_i32 : i32, i32
  }
  func.func @transform_1(%arg0: i32) -> (i32, i32) {
    %c0_i32 = arith.constant 0 : i32
    %c0_i32_0 = arith.constant 0 : i32
    return %arg0, %c0_i32 : i32, i32
  }
}

</mosaic_0001>

<bundles_post_ra>
// kernel: tpu_custom_call.1
= control target key start
LH: loop header
LB: loop body
LE: loop exit
PB: predicated region body
PF: predicated region fallthrough
CT: control target
= control target key end

     0   :  { %6 = vsyncpa [#allocation3], 0  ;;  %s126_s0 = inlined_call_operand.hbm [shape: f32[2,1024], index: 0, kind: input, shape index: {}]   ;;  %s127_s1 = inlined_call_operand.hbm [shape: f32[2,1024], index: 1, kind: output, shape index: {}]  }
   0x1   :  { %7 = vsyncpa [#allocation4], 0  ;;  %s90_s6 = smov [#allocation2]   ;;  %s42_s10 = scalar_lea.hbm %s126_s0, 256 }
   0x2   :  { %s14_s7 = sshll.u32 %s90_s6, 4  ;;  %p43_p0 = scmp.ne.s32.totalorder %s126_s0, %s42_s10  ;;  %s15_s7 = int_to_ptr.vmem [resolvable:$true] %s14_s7 }
   0x3   :  { %p46_p1 = scmp.lt.u32.totalorder %s42_s10, %s126_s0 }
   0x5   :  { %p48_p2 = pnand %p46_p1, %p43_p0 }
   0x7   :  { %51 = shalt.err (!%p48_p2)
}
   0x8   :  { %s52_s15 = scalar_lea.vmem %s15_s7, 256  ;;  %p57_p4 = scmp.lt.s32.totalorder %s15_s7, %s15_s7 }
   0x9   :  { %p53_p3 = scmp.ne.s32.totalorder %s15_s7, %s52_s15  ;;  %p58_p5 = scmp.lt.s32.totalorder %s52_s15, %s52_s15 }
   0xb   :  { %p59_p6 = por %p58_p5, %p57_p4 }
   0xd   :  { %p60_p7 = pnand %p59_p6, %p53_p3 }
   0xf   :  { %63 = shalt.err (!%p60_p7)
}
  0x10   :  { %17 = dma.hbm_to_vmem [thread:$0]  %s126_s0, 256, %s15_s7, [#allocation3]  }
  0x11   :  { %86 = dma.done.wait [#allocation3], 256  }
  0x12   :  { %87 = vsyncadd [#allocation3], 4294967040  ;;  %s91_s18 = smov [#allocation5]   ;;  %v21_v0 = vld [vmem:[#allocation2] sm:$0xff]  ;;  %v22_v1 = vld [vmem:[#allocation2 + $0x8] sm:$0xff] }
  0x13   :  { %s31_s19 = sshll.u32 %s91_s18, 4  ;;  %23 = vst [vmem:[#allocation5] sm:$0xff] %v21_v0  ;;  %24 = vst [vmem:[#allocation5 + $0x8] sm:$0xff] %v22_v1  ;;  %s32_s19 = int_to_ptr.vmem [resolvable:$true] %s31_s19 }
  0x14   :  { %s64_s20 = scalar_lea.vmem %s32_s19, 256  ;;  %p69_p9 = scmp.lt.s32.totalorder %s32_s19, %s32_s19 }
  0x15   :  { %p65_p8 = scmp.ne.s32.totalorder %s32_s19, %s64_s20  ;;  %p70_p10 = scmp.lt.s32.totalorder %s64_s20, %s64_s20 }
  0x17   :  { %p71_p11 = por %p70_p10, %p69_p9 }
  0x19   :  { %p72_p12 = pnand %p71_p11, %p65_p8 }
  0x1b   :  { %75 = shalt.err (!%p72_p12)
}
  0x1c   :  { %s76_s0 = scalar_lea.hbm %s127_s1, 256 }
  0x1d   :  { %p77_p13 = scmp.ne.s32.totalorder %s127_s1, %s76_s0  ;;  %p80_p0 = scmp.lt.u32.totalorder %s76_s0, %s127_s1 }
  0x1f   :  { %p82_p1 = pnand %p80_p0, %p77_p13 }
  0x21   :  { %85 = shalt.err (!%p82_p1)
}
  0x22   :  { %34 = dma.vmem_to_hbm [thread:$0]  %s32_s19, 256, %s127_s1, [#allocation4]  }
  0x23   :  { %88 = dma.done.wait [#allocation4], 256  }
  0x24   :  { %89 = vsyncadd [#allocation4], 4294967040 }
  0x25   :  { %38 = vsyncpa [#allocation3], 1 }
  0x26   :  { %39 = vsyncpa [#allocation4], 1 }

</bundles_post_ra>
